<compile_context>
chip_gen: v5e
topology: v5e:2x2
jax: 0.10.0
libtpu: 0.0.40
codegen_flags: <defaults>
</compile_context>

<pallas_src>
import functools

import jax
import jax.numpy as jnp
from jax import lax
from jax.experimental import pallas as pl
from jax.experimental.pallas import tpu as pltpu


def _logsigmoid(x):
    # numerically stable: logsigmoid(x) = min(x, 0) - log1p(exp(-|x|))
    return jnp.minimum(x, 0.0) - jnp.log1p(jnp.exp(-jnp.abs(x)))


def nssal_neg_kernel(neg_ref, out_ref, m_ref, d_ref, s_ref, *,
                     gamma, temp, true_b, true_n, tb, tn):
    """Online-softmax accumulation of sum_j softmax_j(z) * logsigmoid(-(gamma+neg))."""
    i = pl.program_id(0)           # batch-tile index          ("parallel")
    n = pl.program_id(1)           # negatives-tile index      ("arbitrary", last)

    @pl.when(n == 0)
    def _init():
        m_ref[...] = jnp.full_like(m_ref, -jnp.inf)
        d_ref[...] = jnp.zeros_like(d_ref)
        s_ref[...] = jnp.zeros_like(s_ref)

    a = neg_ref[...].astype(jnp.float32) + gamma              # (tb, tn)
    # softmax logits; specialize the common temp == 1.0 case at trace time
    z = a if temp == 1.0 else a * temp
    neg_ls = _logsigmoid(-a)                                   # (tb, tn)

    # Lane mask for a partial last negatives tile (statically skipped when
    # N % tn == 0).  Masked lanes contribute exp(-inf)=0 to the denominator
    # and 0 to the weighted sum.
    if true_n % tn:
        col = lax.broadcasted_iota(jnp.int32, (tb, tn), 1) + n * tn
        valid = col < true_n
        z = jnp.where(valid, z, -jnp.inf)
        neg_ls = jnp.where(valid, neg_ls, 0.0)

    # online softmax update (flash-attention style running statistics)
    m_old = m_ref[...]                                         # (tb, 1)
    m_new = jnp.maximum(m_old, jnp.max(z, axis=-1, keepdims=True))
    alpha = jnp.exp(m_old - m_new)                             # exactly 0 on first step
    e = jnp.exp(z - m_new)                                     # (tb, tn)
    d_ref[...] = alpha * d_ref[...] + jnp.sum(e, axis=-1, keepdims=True)
    s_ref[...] = alpha * s_ref[...] + jnp.sum(e * neg_ls, axis=-1, keepdims=True)
    m_ref[...] = m_new

    @pl.when(n == pl.num_programs(1) - 1)
    def _finalize():
        # per-row self-adversarial negative score: weighted-sum / denominator
        # (one reciprocal per ROW, so its cost is negligible; approx uses the
        #  otherwise-free EUP slot)
        neg_score = s_ref[...] * pl.reciprocal(d_ref[...], approx=True)   # (tb, 1)
        if true_b % tb:   # mask padded rows of a partial last batch tile
            row = lax.broadcasted_iota(jnp.int32, (tb, 1), 0) + i * tb
            neg_score = jnp.where(row < true_b, neg_score, 0.0)
        # lane-dense, unmasked full-vreg store; the wrapper sums everything and
        # divides by B.  1/1024 is an exact power of two.
        partial = jnp.sum(neg_score) * (1.0 / (8.0 * 128.0))
        out_ref[...] = jnp.full(out_ref.shape, partial, dtype=out_ref.dtype)


def _round_up(x, m):
    return ((x + m - 1) // m) * m


def _choose_tiles(B, N, itemsize):
    # Negatives-axis tile: lane-dense multiple of 128, bounded for huge N
    # (the online softmax keeps correctness independent of tn).
    tn = min(_round_up(N, 128), 512)
    # Batch-axis tile: budget the REAL per-step working set:
    #   2 x (tb, tn) double-buffered input + ~4 live (tb, tn) f32 temporaries.
    per_row_bytes = tn * (2 * itemsize + 4 * 4)
    budget_bytes = 4 * 1024 * 1024                      # ~4 MiB working set
    tb = max(8, (budget_bytes // per_row_bytes) // 8 * 8)
    # Cap: never bigger than (padded) B, and force >= 2 batch tiles when B > 8
    # so the "parallel" axis can split across v7x's two TensorCores.
    tb = min(tb, _round_up(B, 8), max(8, _round_up(pl.cdiv(B, 2), 8)))
    return tb, tn


def nssal_loss(positive_samples_score, negative_samples_score,
               gamma=4.0, adversarial_temperature=1.0):
    """Pallas TPU implementation of NSSAL.forward (default flags). Forward only."""
    # TODO(synk): wrap in jax.custom_vjp (keeping the softmax weights detached,
    # i.e. the s_a_g/adversarial semantics) before using under jax.grad.
    pos = positive_samples_score
    neg = negative_samples_score
    B, N = neg.shape
    assert pos.shape == (B, 1)

    itemsize = jnp.dtype(neg.dtype).itemsize
    tb, tn = _choose_tiles(B, N, itemsize)
    num_b_tiles = pl.cdiv(B, tb)
    num_n_tiles = pl.cdiv(N, tn)

    kernel = functools.partial(
        nssal_neg_kernel,
        gamma=float(gamma), temp=float(adversarial_temperature),
        true_b=B, true_n=N, tb=tb, tn=tn)

    # Explicit scoped-VMEM limit: real working set x2 headroom, floored at the
    # smallest per-chip default (16 MiB, v5e) and capped at 32 MiB (safe on
    # v7x's 64 MiB physical VMEM).
    work_bytes = (2 * tb * tn * itemsize + 6 * tb * tn * 4
                  + 2 * 8 * 128 * 4 + 3 * tb * 4)
    vmem_limit = int(min(32 << 20, max(16 << 20, 2 * work_bytes)))

    cost = pl.CostEstimate(
        flops=10 * B * N,
        transcendentals=3 * B * N,            # exp(z-m), exp(-|a|), log1p per element
        bytes_accessed=B * N * itemsize + num_b_tiles * 8 * 128 * 4)

    partials = pl.pallas_call(
        kernel,
        out_shape=jax.ShapeDtypeStruct((num_b_tiles, 8, 128), jnp.float32),
        grid=(num_b_tiles, num_n_tiles),
        in_specs=[pl.BlockSpec((tb, tn), lambda i, n: (i, n))],
        out_specs=pl.BlockSpec((1, 8, 128), lambda i, n: (i, 0, 0)),
        scratch_shapes=[pltpu.VMEM((tb, 1), jnp.float32),    # running max
                        pltpu.VMEM((tb, 1), jnp.float32),    # running denominator
                        pltpu.VMEM((tb, 1), jnp.float32)],   # running weighted sum
        compiler_params=pltpu.CompilerParams(
            dimension_semantics=("parallel", "arbitrary"),
            vmem_limit_bytes=vmem_limit),
        cost_estimate=cost,
    )(neg)

    neg_loss = -jnp.sum(partials) / B

    # positive branch: O(B) work, plain JAX in the wrapper
    pos_ls = _logsigmoid(float(gamma) + pos.astype(jnp.float32))   # (B, 1)
    pos_loss = -jnp.mean(pos_ls)

    return (pos_loss + neg_loss) * 0.5


def nssal_reference(pos, neg, gamma=4.0, temp=1.0):
    # pure-JAX reference mirroring the PyTorch forward (default flags)
    p = jax.nn.log_sigmoid(gamma + pos.astype(jnp.float32)).squeeze(-1)
    z = gamma + neg.astype(jnp.float32)
    w = jax.nn.softmax(z * temp, axis=-1)
    n = jnp.sum(w * jax.nn.log_sigmoid(-z), axis=1)
    return ((-p.mean()) + (-n.mean())) / 2.0


if __name__ == "__main__":
    key = jax.random.PRNGKey(0)
    k1, k2 = jax.random.split(key)
    # B not a multiple of 8 (exercises batch-row mask); N not a multiple of the
    # 512-wide negatives tile (exercises the lane mask + multi-step online softmax).
    B, N = 12, 640
    positive_samples_score = jax.random.normal(k1, (B, 1), dtype=jnp.float32)
    negative_samples_score = jax.random.normal(k2, (B, N), dtype=jnp.float32)

    loss = nssal_loss(positive_samples_score, negative_samples_score)
    loss = jax.block_until_ready(loss)

    ref = nssal_reference(positive_samples_score, negative_samples_score)
    # tolerance accounts for pl.reciprocal(approx=True) in the once-per-row divide;
    # structural/semantic errors would be orders of magnitude larger.
    assert jnp.allclose(loss, ref, atol=2e-3, rtol=2e-3), (loss, ref)

    print("KERNEL_OK")
</pallas_src>

<mosaic_0001>
module attributes {stable_mosaic.version = 11 : i64} {
  func.func @nssal_neg_kernel(%arg0: i32, %arg1: i32, %arg2: memref<8x512xf32, #tpu.memory_space<vmem>>, %arg3: memref<1x8x128xf32, #tpu.memory_space<vmem>>, %arg4: memref<8x1xf32, #tpu.memory_space<vmem>>, %arg5: memref<8x1xf32, #tpu.memory_space<vmem>>, %arg6: memref<8x1xf32, #tpu.memory_space<vmem>>) attributes {dimension_semantics = [#tpu.dimension_semantics<parallel>, #tpu.dimension_semantics<arbitrary>], iteration_bounds = array<i64: 2, 2>, scalar_prefetch = 0 : i64, scratch_operands = 3 : i64, tpu.core_type = #tpu.core_type<tc>, window_params = [{transform_indices = @transform_0, window_bounds = array<i64: 8, 512>}, {transform_indices = @transform_1, window_bounds = array<i64: 1, 8, 128>}]} {
    %c0_i32 = arith.constant 0 : i32
    %0 = arith.cmpi eq, %arg1, %c0_i32 : i32
    %1 = arith.extui %0 : i1 to i32
    %c0_i32_0 = arith.constant 0 : i32
    %2 = arith.cmpi ne, %1, %c0_i32_0 : i32
    scf.if %2 {
      %cst_23 = arith.constant 0xFF800000 : f32
      %52 = vector.broadcast %cst_23 : f32 to vector<8x1xf32>
      %c0_24 = arith.constant 0 : index
      %c0_25 = arith.constant 0 : index
      %53 = vector.load %arg4[%c0_24, %c0_25] : memref<8x1xf32, #tpu.memory_space<vmem>>, vector<8x1xf32>
      tpu.vector_store %arg4[%c0_24, %c0_25], %52 {strides = array<i32>} : memref<8x1xf32, #tpu.memory_space<vmem>>, vector<8x1xf32>,
      %cst_26 = arith.constant 0.000000e+00 : f32
      %54 = vector.broadcast %cst_26 : f32 to vector<8x1xf32>
      %c0_27 = arith.constant 0 : index
      %c0_28 = arith.constant 0 : index
      %55 = vector.load %arg5[%c0_27, %c0_28] : memref<8x1xf32, #tpu.memory_space<vmem>>, vector<8x1xf32>
      tpu.vector_store %arg5[%c0_27, %c0_28], %54 {strides = array<i32>} : memref<8x1xf32, #tpu.memory_space<vmem>>, vector<8x1xf32>,
      %cst_29 = arith.constant 0.000000e+00 : f32
      %56 = vector.broadcast %cst_29 : f32 to vector<8x1xf32>
      %c0_30 = arith.constant 0 : index
      %c0_31 = arith.constant 0 : index
      %57 = vector.load %arg6[%c0_30, %c0_31] : memref<8x1xf32, #tpu.memory_space<vmem>>, vector<8x1xf32>
      tpu.vector_store %arg6[%c0_30, %c0_31], %56 {strides = array<i32>} : memref<8x1xf32, #tpu.memory_space<vmem>>, vector<8x1xf32>,
    } else {
    }
    %c0 = arith.constant 0 : index
    %c0_1 = arith.constant 0 : index
    %3 = vector.load %arg2[%c0, %c0_1] : memref<8x512xf32, #tpu.memory_space<vmem>>, vector<8x512xf32>
    %cst = arith.constant 4.000000e+00 : f32
    %4 = vector.broadcast %cst : f32 to vector<8x512xf32>
    %5 = arith.addf %3, %4 : vector<8x512xf32>
    %cst_2 = arith.constant 0.000000e+00 : f32
    %6 = vector.broadcast %cst_2 : f32 to vector<8x512xf32>
    %7 = arith.subf %6, %5 : vector<8x512xf32>
    %cst_3 = arith.constant 0.000000e+00 : f32
    %8 = vector.broadcast %cst_3 : f32 to vector<8x512xf32>
    %9 = arith.minimumf %7, %8 : vector<8x512xf32>
    %10 = math.absf %7 : vector<8x512xf32>
    %cst_4 = arith.constant 0.000000e+00 : f32
    %11 = vector.broadcast %cst_4 : f32 to vector<8x512xf32>
    %12 = arith.subf %11, %10 : vector<8x512xf32>
    %13 = math.exp %12 : vector<8x512xf32>
    %14 = math.log1p %13 : vector<8x512xf32>
    %15 = arith.subf %9, %14 : vector<8x512xf32>
    %16 = tpu.iota {dimensions = array<i32: 1>} : vector<8x512xi32>
    %c512_i32 = arith.constant 512 : i32
    %17 = arith.muli %arg1, %c512_i32 : i32
    %18 = vector.broadcast %17 : i32 to vector<8x512xi32>
    %19 = arith.addi %16, %18 : vector<8x512xi32>
    %c640_i32 = arith.constant 640 : i32
    %20 = vector.broadcast %c640_i32 : i32 to vector<8x512xi32>
    %21 = arith.cmpi slt, %19, %20 : vector<8x512xi32>
    %cst_5 = arith.constant 0xFF800000 : f32
    %22 = vector.broadcast %cst_5 : f32 to vector<8x512xf32>
    %23 = arith.select %21, %5, %22 : vector<8x512xi1>, vector<8x512xf32>
    %cst_6 = arith.constant 0.000000e+00 : f32
    %24 = vector.broadcast %cst_6 : f32 to vector<8x512xf32>
    %25 = arith.select %21, %15, %24 : vector<8x512xi1>, vector<8x512xf32>
    %c0_7 = arith.constant 0 : index
    %c0_8 = arith.constant 0 : index
    %26 = vector.load %arg4[%c0_7, %c0_8] : memref<8x1xf32, #tpu.memory_space<vmem>>, vector<8x1xf32>
    %cst_9 = arith.constant dense<0xFF800000> : vector<8xf32>
    %27 = vector.multi_reduction <maximumf>, %23, %cst_9 [1] : vector<8x512xf32> to vector<8xf32>
    %28 = vector.shape_cast %27 : vector<8xf32> to vector<8x1xf32>
    %29 = arith.maximumf %26, %28 : vector<8x1xf32>
    %30 = arith.subf %26, %29 : vector<8x1xf32>
    %31 = math.exp %30 : vector<8x1xf32>
    %32 = vector.broadcast %29 : vector<8x1xf32> to vector<8x512xf32>
    %33 = arith.subf %23, %32 : vector<8x512xf32>
    %34 = math.exp %33 : vector<8x512xf32>
    %c0_10 = arith.constant 0 : index
    %c0_11 = arith.constant 0 : index
    %35 = vector.load %arg5[%c0_10, %c0_11] : memref<8x1xf32, #tpu.memory_space<vmem>>, vector<8x1xf32>
    %36 = arith.mulf %31, %35 : vector<8x1xf32>
    %cst_12 = arith.constant dense<0.000000e+00> : vector<8xf32>
    %37 = vector.multi_reduction <add>, %34, %cst_12 [1] : vector<8x512xf32> to vector<8xf32>
    %38 = vector.shape_cast %37 : vector<8xf32> to vector<8x1xf32>
    %39 = arith.addf %36, %38 : vector<8x1xf32>
    %c0_13 = arith.constant 0 : index
    %c0_14 = arith.constant 0 : index
    %40 = vector.load %arg5[%c0_13, %c0_14] : memref<8x1xf32, #tpu.memory_space<vmem>>, vector<8x1xf32>
    tpu.vector_store %arg5[%c0_13, %c0_14], %39 {strides = array<i32>} : memref<8x1xf32, #tpu.memory_space<vmem>>, vector<8x1xf32>,
    %c0_15 = arith.constant 0 : index
    %c0_16 = arith.constant 0 : index
    %41 = vector.load %arg6[%c0_15, %c0_16] : memref<8x1xf32, #tpu.memory_space<vmem>>, vector<8x1xf32>
    %42 = arith.mulf %31, %41 : vector<8x1xf32>
    %43 = arith.mulf %34, %25 : vector<8x512xf32>
    %cst_17 = arith.constant dense<0.000000e+00> : vector<8xf32>
    %44 = vector.multi_reduction <add>, %43, %cst_17 [1] : vector<8x512xf32> to vector<8xf32>
    %45 = vector.shape_cast %44 : vector<8xf32> to vector<8x1xf32>
    %46 = arith.addf %42, %45 : vector<8x1xf32>
    %c0_18 = arith.constant 0 : index
    %c0_19 = arith.constant 0 : index
    %47 = vector.load %arg6[%c0_18, %c0_19] : memref<8x1xf32, #tpu.memory_space<vmem>>, vector<8x1xf32>
    tpu.vector_store %arg6[%c0_18, %c0_19], %46 {strides = array<i32>} : memref<8x1xf32, #tpu.memory_space<vmem>>, vector<8x1xf32>,
    %c0_20 = arith.constant 0 : index
    %c0_21 = arith.constant 0 : index
    %48 = vector.load %arg4[%c0_20, %c0_21] : memref<8x1xf32, #tpu.memory_space<vmem>>, vector<8x1xf32>
    tpu.vector_store %arg4[%c0_20, %c0_21], %29 {strides = array<i32>} : memref<8x1xf32, #tpu.memory_space<vmem>>, vector<8x1xf32>,
    %c1_i32 = arith.constant 1 : i32
    %49 = arith.cmpi eq, %arg1, %c1_i32 : i32
    %50 = arith.extui %49 : i1 to i32
    %c0_i32_22 = arith.constant 0 : i32
    %51 = arith.cmpi ne, %50, %c0_i32_22 : i32
    scf.if %51 {
      %c0_23 = arith.constant 0 : index
      %c0_24 = arith.constant 0 : index
      %52 = vector.load %arg6[%c0_23, %c0_24] : memref<8x1xf32, #tpu.memory_space<vmem>>, vector<8x1xf32>
      %c0_25 = arith.constant 0 : index
      %c0_26 = arith.constant 0 : index
      %53 = vector.load %arg5[%c0_25, %c0_26] : memref<8x1xf32, #tpu.memory_space<vmem>>, vector<8x1xf32>
      %54 = tpu.reciprocal %53 {approx = true} : vector<8x1xf32> -> vector<8x1xf32>
      %55 = arith.mulf %52, %54 : vector<8x1xf32>
      %56 = tpu.iota {dimensions = array<i32: 0>} : vector<8x1xi32>
      %c8_i32 = arith.constant 8 : i32
      %57 = arith.muli %arg0, %c8_i32 : i32
      %58 = vector.broadcast %57 : i32 to vector<8x1xi32>
      %59 = arith.addi %56, %58 : vector<8x1xi32>
      %c12_i32 = arith.constant 12 : i32
      %60 = vector.broadcast %c12_i32 : i32 to vector<8x1xi32>
      %61 = arith.cmpi slt, %59, %60 : vector<8x1xi32>
      %cst_27 = arith.constant 0.000000e+00 : f32
      %62 = vector.broadcast %cst_27 : f32 to vector<8x1xf32>
      %63 = arith.select %61, %55, %62 : vector<8x1xi1>, vector<8x1xf32>
      %64 = vector.shape_cast %63 : vector<8x1xf32> to vector<1x8x1xf32>
      %cst_28 = arith.constant dense<0.000000e+00> : vector<1xf32>
      %65 = vector.multi_reduction <add>, %64, %cst_28 [1, 2] : vector<1x8x1xf32> to vector<1xf32>
      %66 = vector.shape_cast %65 : vector<1xf32> to vector<1x1x1xf32>
      %67 = vector.extract %66[0, 0, 0] : f32 from vector<1x1x1xf32>
      %cst_29 = arith.constant 9.765625E-4 : f32
      %68 = arith.mulf %67, %cst_29 : f32
      %69 = vector.broadcast %68 : f32 to vector<1x8x128xf32>
      %c0_30 = arith.constant 0 : index
      %c0_31 = arith.constant 0 : index
      %c0_32 = arith.constant 0 : index
      %70 = vector.load %arg3[%c0_30, %c0_31, %c0_32] : memref<1x8x128xf32, #tpu.memory_space<vmem>>, vector<1x8x128xf32>
      tpu.vector_store %arg3[%c0_30, %c0_31, %c0_32], %69 {strides = array<i32>} : memref<1x8x128xf32, #tpu.memory_space<vmem>>, vector<1x8x128xf32>,
    } else {
    }
    return
  }
  func.func @transform_0(%arg0: i32, %arg1: i32) -> (i32, i32) {
    %c0_i32 = arith.constant 0 : i32
    return %arg0, %arg1 : i32, i32
  }
  func.func @transform_1(%arg0: i32, %arg1: i32) -> (i32, i32, i32) {
    %c0_i32 = arith.constant 0 : i32
    %c0_i32_0 = arith.constant 0 : i32
    %c0_i32_1 = arith.constant 0 : i32
    return %arg0, %c0_i32, %c0_i32_0 : i32, i32, i32
  }
}

</mosaic_0001>

<bundles_post_ra>
// kernel: tpu_custom_call.1
= control target key start
LH: loop header
LB: loop body
LE: loop exit
PB: predicated region body
PF: predicated region fallthrough
CT: control target
= control target key end

     0   :  { %6 = vsyncpa [#allocation6], 0  ;;  %s1041_s0 = inlined_call_operand.hbm [shape: f32[12,640], index: 0, kind: input, shape index: {}]   ;;  %s1042_s1 = inlined_call_operand.hbm [shape: f32[2,8,128], index: 1, kind: output, shape index: {}]  }
   0x1   :  { %8 = vsyncpa [#allocation6 + $0x1], 0 }
   0x2   :  { %9 = vsyncpa [#allocation7], 0 }
   0x3   :  { %11 = vsyncpa [#allocation7 + $0x1], 0  ;;  %s775_s6 = smov 0   ;;  %s777_s7 = smov 0  }
   0x4   :  { %s779_s8 = smov 0   ;;  %s781_s9 = smov 0  }
   0x5   :  { %s783_s10 = smov 0   ;;  %s785_s11 = smov 0  }
   0x6   :  { %s787_s12 = smov 0   ;;  %s789_s13 = smov 0  }
   0x7   :  { %s791_s14 = smov 0   ;;  %s793_s15 = smov 0  }
   0x8   :  { %s795_s16 = smov 0  }
   0x9 LB: > { %1047 = sst [smem:[#allocation11_spill]] %s751_s14  ;;  %s445_s17 = sadd.s32 4294967295, %s759_s16   ;;  %s759_s16 = sphi %s795_s16, %s17_s16   ;;  %s755_s15 = sphi %s793_s15, %s1061_s15   ;;  %s751_s14 = sphi %s791_s14, %s1060_s14   ;;  %s747_s13 = sphi %s789_s13, %s1059_s13   ;;  %s743_s12 = sphi %s787_s12, %s1058_s12   ;;  %s739_s11 = sphi %s785_s11, %s1067_s11   ;;  %s735_s10 = sphi %s783_s10, %s1066_s10   ;;  %s731_s9 = sphi %s781_s9, %s1065_s9   ;;  %s727_s8 = sphi %s779_s8, %s1064_s8   ;;  %s723_s7 = sphi %s777_s7, %s1063_s7   ;;  %s719_s6 = sphi %s775_s6, %s1062_s6  }
   0xa   : > { %1048 = sst [smem:[#allocation12_spill]] %s755_s15  ;;  %s446_s18 = sadd.s32 4294967294, %s759_s16  }
   0xb   : > { %s26_s19 = sadd.s32 1, %s751_s14  ;;  %s29_s20 = sadd.s32 1, %s755_s15 }
   0xc   : > { %p27_p0 = scmp.ge.s32.totalorder %s26_s19, 2  ;;  %s38_s21 = sadd.s32 1, %s739_s11 }
   0xd   : > { %p45_p1 = scmp.ne.s32.totalorder %s739_s11, %s735_s10  ;;  %p46_p2 = scmp.eq.s32.totalorder %s759_s16, 0 }
   0xe   : > { %s1069_s19 = smov (%p27_p0, %s26_s19), 0  ;;  %s1071_s20 = smov (!%p27_p0, %s29_s20), %s755_s15 }
   0xf   : > { %1049 = sst [smem:[#allocation13_spill]] %s1069_s19  ;;  %s34_s22 = ssub.s32 %s751_s14, %s1069_s19 }
  0x10   : > { %p841_p3 = por %p46_p2, %p45_p1  ;;  %p31_p4 = scmp.ge.s32.totalorder %s1071_s20, 2 }
  0x11   : > { %p51_p5 = scmp.ne.s32.totalorder %s735_s10, %s731_s9  ;;  %p52_p6 = scmp.eq.s32.totalorder %s445_s17, 0 }
  0x12   : > { %s64_s24 = sadd.s32 1, %s727_s8  ;;  %s1073_s20 = smov (%p31_p4, %s1071_s20), 0 }
  0x13   : > { %1051 = sst [smem:[#allocation14_spill]] %s1073_s20  ;;  %p849_p7 = por %p52_p6, %p51_p5 }
  0x14   : > { %p74_p8 = scmp.ne.s32.totalorder %s727_s8, %s723_s7  ;;  %s33_s26 = ssub.s32 %s755_s15, %s1073_s20 }
  0x15   : > { %p75_p9 = scmp.eq.s32.totalorder %s445_s17, 3  ;;  %s35_s27 = sor.u32 %s34_s22, %s33_s26 }
  0x16   : > { %p62_p10 = scmp.eq.s32.totalorder %s33_s26, 0  ;;  %p36_p11 = scmp.eq.s32.totalorder %s35_s27, 0 }
  0x17   : > { %p857_p12 = por %p75_p9, %p74_p8  ;;  %p80_p13 = scmp.ne.s32.totalorder %s723_s7, %s719_s6 }
  0x18   : > { %s862_s29 = scalar_select %p62_p10, %s727_s8, %s64_s24  }
  0x19   : > { %s865_s30 = scalar_select %p36_p11, %s739_s11, %s38_s21  }
  0x1a   : > { %p81_p0 = scmp.eq.s32.totalorder %s446_s18, 3  ;;  %p448_p2 = scmp.ge.s32.totalorder %s759_s16, 4 }
  0x1b   : > { %1054 = sst [smem:[#allocation15_spill]] %s865_s30 }
  0x1c   : > { %p869_p1 = por %p81_p0, %p80_p13  ;;  %97 = sbr.rel (%p448_p2) target bundleno = 71 (0x47), region = 16 }
  0x21   : > { %100 = sbr.rel (!%p841_p3) target bundleno = 71 (0x47), region = 20  ;;  %s101_s3 = sand.u32 (%p841_p3), 1, %s739_s11  }
  0x22   : > { %s450_s4 = sshll.u32 (%p841_p3), %s751_s14, 2  ;;  %s449_s5 = sshll.u32 (%p841_p3), %s101_s3, 5 }
  0x23   : > { %s107_s9 = ssub.s32 (%p841_p3), 5, %s450_s4  ;;  %s881_s22 = scalar_lea.sflag (%p841_p3), [#allocation6], %s101_s3 }
  0x24   : > { %p108_p4 = scmp.lt.s32.totalorder (%p841_p3), %s107_s9, 4  ;;  %s105_s24 = scalar_lea.vmem (%p841_p3), [#allocation5], %s449_s5 }
  0x26   : > { %s1075_s9 = smov (!%p108_p4, %s107_s9), 4 }
  0x27   : > { %s451_s17 = sshll.u32 %s1075_s9, 3 }
  0x28   : > { %s111_s18 = ssub.s32 32, %s451_s17 }
  0x29   : > { %s112_s21 = sshll.u32 %s111_s18, 4 }
  0x2a   : > { %113 = vsyncadd %s881_s22, %s112_s21  ;;  %s467_s23 = smul.u32 5, %s755_s15  ;;  %s885_s26 = sshll.u32 %s105_s24, 4  ;;  %s124_s26 = int_to_ptr.vmem [resolvable:$true] %s885_s26 }
  0x2b   : > { %p887_p3 = scmp.ne.s32.totalorder %s451_s17, 0  ;;  %s455_s18 = sshll.u32 %s1075_s9, 7 }
  0x2c   : > { %s116_s20 = sadd.s32 %s467_s23, %s450_s4  ;;  %s600_s24 = sshrl.u32 %s455_s18, 4 }
  0x2d   : > { %s453_s19 = sshll.u32 %s116_s20, 3  ;;  %s609_s20 = scalar_lea.hbm %s1041_s0, 80 }
  0x2e   : > { %s118_s5 = scalar_lea.hbm %s1041_s0, %s453_s19 }
  0x2f   : > { %s121_s21 = sshll.u32 %s118_s5, 4  ;;  %s122_s21 = int_to_ptr.hbm [resolvable:$true] %s121_s21 }
  0x30   : > { %s598_s30 = sshra.s32 %s122_s21, 4  ;;  %s599_s30 = int_to_ptr.hbm [resolvable:$true] %s598_s30 }
  0x31   : > { %s605_s15 = scalar_lea.hbm %s599_s30, %s600_s24 }
  0x32   : > { %p606_p5 = scmp.ne.s32.totalorder %s599_s30, %s605_s15  ;;  %p611_p9 = scmp.lt.s32.totalorder %s609_s20, %s605_s15 }
  0x34   : > { %p607_p6 = pnand %p606_p5, %p887_p3 }
  0x36   : > { %p608_p8 = pneg %p607_p6 }
  0x38   : > { %p613_p10 = pnand %p611_p9, %p608_p8 }
  0x3a   : > { %616 = shalt.err (!%p613_p10)
}
  0x3b   : > { %s617_s14 = sshra.s32 %s124_s26, 4  ;;  %s761_s23 = smov [#allocation5]   ;;  %s618_s14 = int_to_ptr.vmem [resolvable:$true] %s617_s14 }
  0x3c   : > { %s624_s19 = scalar_lea.vmem %s618_s14, %s600_s24  ;;  %s628_s30 = scalar_lea.vmem %s761_s23, 64 }
  0x3d   : > { %p625_p11 = scmp.ne.s32.totalorder %s618_s14, %s624_s19  ;;  %p630_p2 = scmp.lt.s32.totalorder %s628_s30, %s624_s19 }
  0x3f   : > { %p626_p13 = pnand %p625_p11, %p887_p3 }
  0x41   : > { %p627_p0 = pneg %p626_p13 }
  0x43   : > { %p632_p4 = pnand %p630_p2, %p627_p0 }
  0x45   : > { %635 = shalt.err (!%p632_p4)
}
  0x46   : > { %126 = dma.hbm_to_vmem [thread:$0]  (%p887_p3), %s122_s21, %s455_s18, %s124_s26, %s881_s22  }
  0x47 PF: > { %p456_p5 = scmp.ge.s32.totalorder %s759_s16, 1  ;;  %p128_p6 = scmp.lt.s32.totalorder %s759_s16, 5 }
  0x49   : > { %p129_p8 = pnand %p456_p5, %p128_p6 }
  0x4a   : > { %s134_s15 = sand.u32 (!%p129_p8), 1, %s735_s10  }
  0x4b   : > { %132 = sbr.rel (%p129_p8) target bundleno = 694 (0x2b6), region = 24  ;;  %s457_s3 = sshll.u32 (!%p129_p8), %s134_s15, 5 }
  0x4c   : > { %s135_s5 = scalar_lea.sflag (!%p129_p8), [#allocation6], %s134_s15  ;;  %s138_s24 = scalar_lea.vmem (!%p129_p8), [#allocation5], %s457_s3 }
  0x50   : > { %710 = dma.done.wait (%p849_p7), %s135_s5, 512  }
  0x51   : > { %712 = vsyncadd (%p849_p7), %s135_s5, 4294966784  ;;  %s155_s9 = sand.u32 1, %s723_s7   ;;  %p459_p3 = scmp.ne.s32.totalorder %s743_s12, 0 }
  0x52   : > { %s920_s22 = sshll.u32 %s155_s9, 3 }
  0x53   : > { %s157_s26 = scalar_lea.vmem [#allocation8], %s920_s22  ;;  %166 = sbr.rel (%p459_p3) target bundleno = 92 (0x5c), region = 32 }
  0x58   : > { %vm167_vm0 = vcmask 7168   ;;  %v762_v0 = vmov -inf   ;;  %v763_v1 = vmov 0.0  }
  0x59   : > { %168 = vst.msk [vmem:[#allocation2] sm:$0xff] %vm167_vm0, %v762_v0 }
  0x5a   : > { %169 = vst.msk [vmem:[#allocation3] sm:$0xff] %vm167_vm0, %v763_v1 }
  0x5b   : > { %170 = vst.msk [vmem:[#allocation4] sm:$0xff] %vm167_vm0, %v763_v1 }
  0x5c PF: > { %v172_v2 = vld [vmem:[%s138_s24 + $0x8] sm:$0xff]  ;;  %v173_v3 = vld [vmem:[%s138_s24 + $0x10] sm:$0xff]  ;;  %v243_v4 = vlaneseq  ;;  %s460_s25 = sshll.u32 %s743_s12, 9  ;;  %v171_v7 = vld [vmem:[%s138_s24] sm:$0xff]  ;;  %vm301_vm8 = vcmask 7168   ;;  %p461_p7 = scmp.ne.s32.totalorder %s743_s12, 1 }
  0x5d   : > { %v176_v5 = vadd.f32 4.0, %v172_v2  ;;  %v925_v6 = vadd.f32 4.0, %v173_v3  ;;  %v174_v9 = vld [vmem:[%s138_s24 + $0x18] sm:$0xff]  ;;  %v249_v12 = vstv %s460_s25  ;;  %v929_v16 = vadd.f32 4.0, %v171_v7  ;;  %s462_s27 = sshll.u32 (!%p461_p7), %s747_s13, 3 }
  0x5e   : > { %v244_v8 = vand.u32 127, %v243_v4  ;;  %v931_v19 = vadd.f32 4.0, %v174_v9 }
  0x5f   : > { %v180_v10 = vsub.f32 0.0, %v176_v5  ;;  %v181_v11 = vsub.f32 0.0, %v925_v6  ;;  %v179_v26 = vsub.f32 0.0, %v929_v16 }
  0x60   : > { %v245_v13 = vadd.s32 128, %v244_v8  ;;  %v246_v14 = vadd.s32 256, %v244_v8  ;;  %v247_v15 = vadd.s32 384, %v244_v8  ;;  %v933_v20 = vadd.s32 %v249_v12, %v244_v8 }
  0x61   : > { %v188_v17 = vand.u32 2147483647, %v180_v10  ;;  %v189_v18 = vand.u32 2147483647, %v181_v11  ;;  %v187_v35 = vand.u32 2147483647, %v179_v26 }
  0x62   : > { %v251_v21 = vadd.s32 %v249_v12, %v245_v13  ;;  %v935_v22 = vadd.s32 %v249_v12, %v246_v14  ;;  %v937_v25 = vadd.s32 %v249_v12, %v247_v15  ;;  %vm254_vm1 = vcmp.lt.s32.totalorder %v933_v20, 640  ;;  %v266_v13 = vld [vmem:[#allocation2] sm:$0xff] }
  0x63   : > { %v192_v23 = vsub.f32 0.0, %v188_v17  ;;  %v193_v24 = vsub.f32 0.0, %v189_v18  ;;  %v946_v29 = vsel %vm254_vm1, %v929_v16, -inf  ;;  %v191_v37 = vsub.f32 0.0, %v187_v35 }
  0x64   : > { %vm255_vm2 = vcmp.lt.s32.totalorder %v251_v21, 640  ;;  %vm256_vm3 = vcmp.lt.s32.totalorder %v935_v22, 640  ;;  %vm257_vm4 = vcmp.lt.s32.totalorder %v937_v25, 640  ;;  %v184_v54 = vmin.f32 %v180_v10, 0.0  ;;  %v303_v25 = vld [vmem:[#allocation4] sm:$0xff] }
  0x65   : > { %v197_v27 = vmul.f32 1.442695, %v192_v23  ;;  %v199_v28 = vmul.f32 1.442695, %v193_v24  ;;  %v949_v30 = vsel %vm255_vm2, %v176_v5, -inf  ;;  %v954_v31 = vsel %vm256_vm3, %v925_v6, -inf }
  0x66   : > { %v959_v32 = vsel %vm257_vm4, %v931_v19, -inf  ;;  %v267_v33 = vmax.f32 %v946_v29, %v949_v30  ;;  %v195_v38 = vmul.f32 1.442695, %v191_v37  ;;  %v185_v57 = vmin.f32 %v181_v11, 0.0 }
  0x67   : > { %570 = vpow2.f32 %v197_v27  ;;  %v268_v34 = vmax.f32 %v954_v31, %v959_v32  ;;  %v183_v6 = vmin.f32 %v179_v26, 0.0  ;;  %v764_v12 = vmov 0  }
  0x68   : > { %572 = vpow2.f32 %v199_v28  ;;  %569 = vset.pattern.permute.xlu0 %v764_v12  ;;  %v182_v17 = vsub.f32 0.0, %v931_v19 }
  0x69   : > { %v269_v36 = vmax.f32 %v267_v33, %v268_v34  ;;  %574 = vpow2.f32 %v195_v38 }
  0x6a   : > { %v190_v18 = vand.u32 2147483647, %v182_v17 }
  0x6b   : > { %270 = vmax.xlane.f32.xlu0 %v269_v36 }
  0x6c   : > { %v194_v21 = vsub.f32 0.0, %v190_v18 }
  0x6d   : > { %v571_v39 = vpop.eup %570 }
  0x6e   : > { %v573_v40 = vpop.eup %572  ;;  %v212_v41 = vadd.f32 1.0, %v571_v39  ;;  %v215_v42 = vmul.f32 -0.5, %v571_v39  ;;  %v218_v46 = vand.u32 2147483647, %v571_v39  ;;  %v201_v22 = vmul.f32 1.442695, %v194_v21 }
  0x6f   : > { %v221_v43 = vadd.f32 1.0, %v573_v40  ;;  %v224_v44 = vmul.f32 -0.5, %v573_v40  ;;  %v575_v48 = vpop.eup %574  ;;  %v227_v49 = vand.u32 2147483647, %v573_v40 }
  0x70   : > { %576 = vlog2.f32 %v212_v41  ;;  %v216_v45 = vadd.f32 1.0, %v215_v42  ;;  %v203_v50 = vadd.f32 1.0, %v575_v48  ;;  %v206_v51 = vmul.f32 -0.5, %v575_v48 }
  0x71   : > { %578 = vlog2.f32 %v221_v43  ;;  %v225_v47 = vadd.f32 1.0, %v224_v44  ;;  %vm219_vm5 = vcmp.lt.f32.partialorder %v218_v46, 0.0004427343  ;;  %vm228_vm6 = vcmp.lt.f32.partialorder %v227_v49, 0.0004427343 }
  0x72   : > { %v217_v52 = vmul.f32 %v571_v39, %v216_v45  ;;  %580 = vlog2.f32 %v203_v50  ;;  %v207_v59 = vadd.f32 1.0, %v206_v51  ;;  %v209_v61 = vand.u32 2147483647, %v575_v48 }
  0x73   : > { %v226_v55 = vmul.f32 %v573_v40, %v225_v47  ;;  %582 = vpow2.f32 %v201_v22  ;;  %v186_v43 = vmin.f32 %v182_v17, 0.0 }
  0x74   : > { %v208_v2 = vmul.f32 %v575_v48, %v207_v59  ;;  %vm210_vm7 = vcmp.lt.f32.partialorder %v209_v61, 0.0004427343  ;;  %v293_v59 = vld [vmem:[#allocation3] sm:$0xff] }
  0x76   : > { %v577_v53 = vpop.eup %576 }
  0x77   : > { %v579_v56 = vpop.eup %578  ;;  %v214_v58 = vmul.f32 0.6931472, %v577_v53 }
  0x78   : > { %v223_v60 = vmul.f32 0.6931472, %v579_v56  ;;  %v581_v3 = vpop.eup %580 }
  0x79   : > { %v220_v62 = vsel %vm219_vm5, %v217_v52, %v214_v58  ;;  %v205_v8 = vmul.f32 0.6931472, %v581_v3  ;;  %v583_v23 = vpop.eup %582 }
  0x7a   : > { %v229_v63 = vsel %vm228_vm6, %v226_v55, %v223_v60  ;;  %v240_v0 = vsub.f32 %v184_v54, %v220_v62  ;;  %v230_v24 = vadd.f32 1.0, %v583_v23  ;;  %v233_v20 = vmul.f32 -0.5, %v583_v23 }
  0x7b   : > { %v241_v1 = vsub.f32 %v185_v57, %v229_v63  ;;  %v211_v9 = vsel %vm210_vm7, %v208_v2, %v205_v8  ;;  %v236_v33 = vand.u32 2147483647, %v583_v23 }
  0x7c   : > { %v263_v5 = vsel %vm255_vm2, %v240_v0, 0.0  ;;  %v239_v10 = vsub.f32 %v183_v6, %v211_v9  ;;  %584 = vlog2.f32 %v230_v24  ;;  %v234_v27 = vadd.f32 1.0, %v233_v20 }
  0x7d   : > { %v264_v7 = vsel %vm256_vm3, %v241_v1, 0.0  ;;  %vm237_vm9 = vcmp.lt.f32.partialorder %v236_v33, 0.0004427343 }
  0x7e   : > { %v262_v11 = vsel %vm254_vm1, %v239_v10, 0.0  ;;  %v235_v41 = vmul.f32 %v583_v23, %v234_v27 }
  0x82   : > { %v585_v26 = vpop.eup %584 }
  0x83   : > { %v232_v37 = vmul.f32 0.6931472, %v585_v26 }
  0x85   : > { %v238_v44 = vsel %vm237_vm9, %v235_v41, %v232_v37 }
  0xde   : > { %v271_v14 = vpop.xlane.xlu0 %270 }
  0xdf   : > { %v272_v15 = vmax.f32 %v266_v13, %v271_v14 }
  0xe1   : > { %v273_v16 = vsub.f32 %v266_v13, %v272_v15  ;;  %316 = vst.msk [vmem:[#allocation2] sm:$0xff] %vm301_vm8, %v272_v15  ;;  %278 = vperm.xlu0 %569, %v272_v15  }
  0xe3   : > { %v274_v57 = vmul.f32 1.442695, %v273_v16 }
 0x153   : > { %v279_v28 = vpop.permute.xlu0 %278 }
 0x154   : > { %v281_v34 = vsub.f32 %v946_v29, %v279_v28  ;;  %v282_v35 = vsub.f32 %v949_v30, %v279_v28  ;;  %v283_v36 = vsub.f32 %v954_v31, %v279_v28  ;;  %v284_v19 = vsub.f32 %v959_v32, %v279_v28 }
 0x155   : > { %v242_v29 = vsub.f32 %v186_v43, %v238_v44 }
 0x156   : > { %v285_v38 = vmul.f32 1.442695, %v281_v34  ;;  %v287_v39 = vmul.f32 1.442695, %v282_v35  ;;  %v289_v40 = vmul.f32 1.442695, %v283_v36 }
 0x157   : > { %v291_v42 = vmul.f32 1.442695, %v284_v19  ;;  %v265_v49 = vsel %vm257_vm4, %v242_v29, 0.0 }
 0x158   : > { %586 = vpow2.f32 %v285_v38 }
 0x159   : > { %588 = vpow2.f32 %v287_v39 }
 0x15a   : > { %590 = vpow2.f32 %v289_v40 }
 0x15b   : > { %592 = vpow2.f32 %v291_v42 }
 0x15c   : > { %594 = vpow2.f32 %v274_v57 }
 0x15e   : > { %v587_v45 = vpop.eup %586 }
 0x15f   : > { %v589_v30 = vpop.eup %588  ;;  %v305_v46 = vmul.f32 %v587_v45, %v262_v11 }
 0x160   : > { %v591_v31 = vpop.eup %590  ;;  %v295_v47 = vadd.f32 %v589_v30, %v587_v45  ;;  %v306_v32 = vmul.f32 %v589_v30, %v263_v5 }
 0x161   : > { %v593_v48 = vpop.eup %592  ;;  %v307_v51 = vmul.f32 %v591_v31, %v264_v7 }
 0x162   : > { %v296_v50 = vadd.f32 %v591_v31, %v295_v47  ;;  %v309_v52 = vadd.f32 %v306_v32, %v305_v46  ;;  %v308_v54 = vmul.f32 %v593_v48, %v265_v49  ;;  %v595_v58 = vpop.eup %594 }
 0x163   : > { %v294_v60 = vmul.f32 %v595_v58, %v293_v59  ;;  %v304_v63 = vmul.f32 %v595_v58, %v303_v25 }
 0x164   : > { %v297_v53 = vadd.f32 %v593_v48, %v296_v50  ;;  %v310_v55 = vadd.f32 %v309_v52, %v307_v51 }
 0x166   : > { %298 = vadd.xlane.f32.xlu1 %v297_v53  ;;  %v311_v56 = vadd.f32 %v310_v55, %v308_v54 }
 0x16e   : > { %312 = vadd.xlane.f32.xlu1 %v311_v56 }
 0x1d9   : > { %v299_v61 = vpop.xlane.xlu1 %298 }
 0x1da   : > { %v300_v62 = vadd.f32 %v299_v61, %v294_v60 }
 0x1dc   : > { %302 = vst.msk [vmem:[#allocation3] sm:$0xff] %vm301_vm8, %v300_v62 }
 0x1e0   : > { %320 = sbr.rel (%p461_p7) target bundleno = 679 (0x2a7), region = 36 }
 0x1e1   : > { %v313_v0 = vpop.xlane.xlu1 %312 }
 0x1e2   : > { %v314_v1 = vadd.f32 %v313_v0, %v304_v63 }
 0x1e4   : > { %315 = vst.msk [vmem:[#allocation4] sm:$0xff] %vm301_vm8, %v314_v1 }
 0x1e5   : > { %v322_v2 = vld [vmem:[#allocation3] sm:$0xff]  ;;  %v326_v3 = vshrl.u32 %v243_v4, 7  ;;  %v328_v5 = vstv %s462_s27 }
 0x1e6   : > { %596 = vrcp.f32 %v322_v2 }
 0x1e7   : > { %v329_v6 = vadd.s32 %v328_v5, %v326_v3 }
 0x1e9   : > { %vm330_vm10 = vcmp.lt.s32.totalorder %v329_v6, 12 }
 0x1eb   : > { %v321_v7 = vld [vmem:[#allocation4] sm:$0xff] }
 0x1ec   : > { %v597_v8 = vpop.eup %596 }
 0x1ed   : > { %v324_v9 = vmul.f32 %v597_v8, %v321_v7 }
 0x1ef   : > { %v331_v10 = vsel %vm330_vm10, %v324_v9, 0.0 }
 0x1f0   : > { %v332_v11 = vsel %vm301_vm8, %v331_v10, 0.0 }
 0x1f1   : > { %333 = vadd.xlane.f32.xlu0 %v332_v11 }
 0x264   : > { %v334_v12 = vpop.xlane.xlu0 %333 }
 0x265   : > { %v335_v13 = vrot.slane %v334_v12, 4 }
 0x267   : > { %v336_v14 = vadd.f32 %v335_v13, %v334_v12 }
 0x269   : > { %v337_v15 = vrot.slane %v336_v14, 2 }
 0x26b   : > { %v338_v16 = vadd.f32 %v337_v15, %v336_v14 }
 0x26d   : > { %v339_v17 = vrot.slane %v338_v16, 1 }
 0x26f   : > { %v340_v4 = vadd.f32 %v339_v17, %v338_v16 }
 0x271   : > { %468 = vpush %v340_v4 }
 0x2a2   : > { %s469_s12 = spop %468 }
 0x2a3   : > { %s342_s18 = smul.f32 0.0009765625, %s469_s12 }
 0x2a5   : > { %v343_v18 = vstv %s342_s18 }
 0x2a6   : > { %344 = vst [vmem:[%s157_s26] sm:$0xff] %v343_v18 }
 0x2a7 PF: > { %s464_s21 = sshll.u32 %s747_s13, 3  ;;  %s358_s14 = sshll.u32 %s157_s26, 4  ;;  %s359_s14 = int_to_ptr.vmem [resolvable:$true] %s358_s14 }
 0x2a8   : > { %s356_s20 = scalar_lea.hbm %s1042_s1, %s464_s21  ;;  %s346_s23 = scalar_lea.sflag [#allocation7], %s155_s9 }
 0x2a9   : > { %s360_s19 = sshll.u32 %s356_s20, 4  ;;  %s657_s5 = scalar_lea.hbm %s1042_s1, 16  ;;  %s361_s19 = int_to_ptr.hbm [resolvable:$true] %s360_s19 }
 0x2aa   : > { %s651_s30 = sshra.s32 %s361_s19, 4  ;;  %s652_s30 = int_to_ptr.hbm [resolvable:$true] %s651_s30 }
 0x2ab   : > { %s653_s15 = scalar_lea.hbm %s652_s30, 8  ;;  %p658_p13 = scmp.lt.s32.totalorder %s652_s30, %s1042_s1 }
 0x2ac   : > { %p654_p9 = scmp.ne.s32.totalorder %s652_s30, %s653_s15  ;;  %p659_p0 = scmp.lt.s32.totalorder %s657_s5, %s653_s15 }
 0x2ae   : > { %p655_p10 = pnand %p654_p9, %p857_p12  ;;  %p660_p2 = por %p659_p0, %p658_p13 }
 0x2b0   : > { %p656_p11 = pneg %p655_p10 }
 0x2b2   : > { %p661_p4 = pnand %p660_p2, %p656_p11 }
 0x2b4   : > { %664 = shalt.err (!%p661_p4)
}
 0x2b5   : > { %471 = dma.vmem_to_hbm [thread:$0]  (%p857_p12), %s359_s14, 128, %s361_s19, %s346_s23  }
 0x2b6 PF: > { %p477_p5 = scmp.ge.s32.totalorder %s759_s16, 2  ;;  %s372_s9 = sand.u32 1, %s719_s6  }
 0x2b7   : > { %s373_s22 = scalar_lea.sflag [#allocation7], %s372_s9 }
 0x2b8   : > { %p474_p6 = pnand %p477_p5, %p869_p1 }
 0x2ba   : > { %p475_p8 = pneg %p474_p6 }
 0x2bc   : > { %714 = dma.done.wait (%p475_p8), %s373_s22, 128  }
 0x2bd   : > { %716 = vsyncadd (%p475_p8), %s373_s22, 4294967168  ;;  %s17_s16 = sadd.s32 1, %s759_s16   ;;  %s1057_s28 = sld [smem:[#allocation15_spill]] }
 0x2be   : > { %p14_p3 = scmp.ge.s32.totalorder %s17_s16, 6   ;;  %s1058_s12 = sld [smem:[#allocation11_spill]] }
 0x2bf   : > { %s1059_s13 = sld [smem:[#allocation12_spill]]  ;;  %s1062_s6 = smov %s723_s7 }
 0x2c0   : > { %s1060_s14 = sld [smem:[#allocation13_spill]]  ;;  %s1063_s7 = smov %s727_s8 }
 0x2c1   : > { %s1061_s15 = sld [smem:[#allocation14_spill]]  ;;  %s1064_s8 = smov %s862_s29 }
 0x2c2   : > { %s1065_s9 = smov %s735_s10  ;;  %s1066_s10 = smov %s739_s11 }
 0x2c3   : > { %s1067_s11 = smov %s1057_s28  ;;  %16 = sbr.rel (!%p14_p3) target bundleno = 9 (0x9), region = 77 }
 0x2c8   :  { %379 = vsyncpa [#allocation6], 1 }
 0x2c9   :  { %381 = vsyncpa [#allocation6 + $0x1], 1 }
 0x2ca   :  { %382 = vsyncpa [#allocation7], 1 }
 0x2cb   :  { %384 = vsyncpa [#allocation7 + $0x1], 1 }

</bundles_post_ra>
